<compile_context>
chip_gen: v7x
topology: tpu7x:2x2x1
jax: 0.10.0
libtpu: 0.0.40
codegen_flags: <defaults>
</compile_context>

<pallas_src>
import functools

import jax
import jax.numpy as jnp
import numpy as np
from jax.experimental import pallas as pl
from jax.experimental.pallas import tpu as pltpu


def _round_up(a, m):
    return (a + m - 1) // m * m


# ------------------------------ Pallas kernel --------------------------------
def _phi_pool_kernel(x_ref,                 # [1, TILE_N, dim_in+1] bf16 (last col = mask)
                     w1_ref, b1_ref,        # [dim_in+1, 128] bf16, [1, 128] f32
                     w2_ref, b2_ref,        # [128, 256]     bf16, [1, 256] f32
                     out_ref,               # [1, 1, 1, 256] f32 (resident accumulator)
                     *, dim_in):
    k = pl.program_id(2)                    # tile index within this (batch, split)

    @pl.when(k == 0)
    def _():
        out_ref[...] = jnp.zeros_like(out_ref)

    xa = x_ref[0]                                             # [TILE_N, dim_in+1] bf16
    m = xa[:, dim_in:dim_in + 1].astype(jnp.float32)          # [TILE_N, 1] mask (0/1 exact)

    # phi layers 1-2: bf16 MXU operands, f32 accumulation, f32 bias + ReLU on
    # the VPU.  (Keep layer-1 operands f32 if tighter-than-bf16 accuracy is
    # ever required; K = dim_in is cheap.)
    h = jnp.dot(xa, w1_ref[...], preferred_element_type=jnp.float32) + b1_ref[...]
    h = jnp.maximum(h, 0.0).astype(jnp.bfloat16)
    h = jnp.dot(h, w2_ref[...], preferred_element_type=jnp.float32) + b2_ref[...]
    h = jnp.maximum(h, 0.0)                                   # [TILE_N, 256] f32

    # Masked pooling on the VPU: zero invalid/padded rows, row-sum over the
    # tile, accumulate into the resident output block (no MXU involvement).
    out_ref[0, 0] += jnp.sum(h * m, axis=0, keepdims=True)    # [1, 256]


# --------------------------------- wrapper ------------------------------------
def deepset_forward(x, mask, params, *, tile_n=4096, n_splits=None):
    """x: [B, N, dim_in] float32, mask: [B, N] (0/1). Returns [B, dim_out] float32.

    tile_n: set-element tile per grid step. 4096 fits comfortably in v7x's 64 MiB
      VMEM; v5e/v6e (128 MiB) can use 8192.
    n_splits: parallel partitions of the set axis (each yields a partial pooled
      vector, summed in the wrapper).  Use >=2 on v7x when B == 1 so both
      TensorCores get work; default auto-picks.
    """
    B, N, dim_in = x.shape
    out_dtype = x.dtype

    # ---- tiling of the set axis ------------------------------------------
    if N <= tile_n:
        tile = _round_up(max(N, 8), 8)
        n_tiles = 1
    else:
        assert tile_n % 8 == 0, "tile_n must be a multiple of 8 when tiling N"
        tile = tile_n
        n_tiles = -(-N // tile)

    if n_splits is None:
        n_splits = 2 if (B == 1 and n_tiles >= 2) else 1      # v7x: keep both TCs busy
    n_splits = max(1, min(int(n_splits), n_tiles))
    n_tiles = _round_up(n_tiles, n_splits)
    k_per_split = n_tiles // n_splits
    n_pad = n_tiles * tile

    mask_f = mask.astype(jnp.float32)
    counts = jnp.sum(mask_f, axis=1, keepdims=True)           # [B, 1] valid counts

    if n_pad != N:
        x = jnp.pad(x, ((0, 0), (0, n_pad - N), (0, 0)))
        mask_f = jnp.pad(mask_f, ((0, 0), (0, n_pad - N)))

    # Mask rides along as an extra feature column (dense, DMA-friendly — no
    # per-row 1-lane mask array); a matching zero row in w1 keeps layer-1 math
    # unchanged.  bf16 operands for the phi MXU matmuls (0/1 mask is exact).
    x_aug = jnp.concatenate([x, mask_f[:, :, None]], axis=-1).astype(jnp.bfloat16)
    w1_aug = jnp.concatenate(
        [params["w1"], jnp.zeros((1, params["w1"].shape[1]), params["w1"].dtype)],
        axis=0).astype(jnp.bfloat16)
    w2 = params["w2"].astype(jnp.bfloat16)
    dp = dim_in + 1

    grid = (B, n_splits, k_per_split)

    def const_spec(shape):                  # weights/biases: full resident block
        nd = len(shape)
        return pl.BlockSpec(shape, lambda b, s, k, _nd=nd: (0,) * _nd)

    pooled_parts = pl.pallas_call(
        functools.partial(_phi_pool_kernel, dim_in=dim_in),
        out_shape=jax.ShapeDtypeStruct((B, n_splits, 1, 256), jnp.float32),
        grid_spec=pltpu.PrefetchScalarGridSpec(
            num_scalar_prefetch=0,
            grid=grid,
            in_specs=[
                pl.BlockSpec((1, tile, dp),
                             lambda b, s, k, _kps=k_per_split: (b, s * _kps + k, 0)),
                const_spec(w1_aug.shape), const_spec(params["b1"].shape),
                const_spec(w2.shape), const_spec(params["b2"].shape),
            ],
            out_specs=pl.BlockSpec((1, 1, 1, 256), lambda b, s, k: (b, s, 0, 0)),
        ),
        compiler_params=pltpu.CompilerParams(
            dimension_semantics=("parallel", "parallel", "arbitrary"),
            vmem_limit_bytes=48 * 1024 * 1024,
        ),
    )(x_aug, w1_aug, params["b1"], w2, params["b2"])

    pooled256 = jnp.sum(pooled_parts[:, :, 0, :], axis=1)     # [B, 256]

    # phi layer 3 commuted past the (linear) pooling: bias scaled once by the
    # batch's total valid count.  rho runs as batched f32 XLA matmuls (single
    # weight pass for all B rows, no resident rho weights in the kernel).
    pooled512 = pooled256 @ params["w3"] + counts * params["b3"]        # [B, 512]
    g = jnp.maximum(pooled512 @ params["w4"] + params["b4"], 0.0)
    g = jnp.maximum(g @ params["w5"] + params["b5"], 0.0)
    g = g @ params["w6"] + params["b6"]                                  # [B, dim_out]

    return jnp.where(counts > 0, g, 0.0).astype(out_dtype)              # empty set -> zeros


# ---------------------------- parameter creation ------------------------------
def make_params(key, dim_in, dim_out):
    """Deterministic Linear params (weights stored as [fan_in, fan_out])."""
    sizes = [(dim_in, 128), (128, 256), (256, 512),      # phi
             (512, 256), (256, 128), (128, dim_out)]     # rho
    params = {}
    for i, (fin, fout) in enumerate(sizes, start=1):
        key, kw, kb = jax.random.split(key, 3)
        bound = 1.0 / np.sqrt(fin)
        params[f"w{i}"] = jax.random.uniform(kw, (fin, fout), jnp.float32, -bound, bound)
        params[f"b{i}"] = jax.random.uniform(kb, (1, fout), jnp.float32, -bound, bound)
    return params


# ------------------------------- JAX reference ---------------------------------
def deepset_reference(x, mask, params):
    h = x
    h = jnp.maximum(h @ params["w1"] + params["b1"], 0.0)
    h = jnp.maximum(h @ params["w2"] + params["b2"], 0.0)
    h = h @ params["w3"] + params["b3"]                                 # [B, N, 512]
    pooled = jnp.sum(h * mask.astype(h.dtype)[:, :, None], axis=1)      # [B, 512]
    g = jnp.maximum(pooled @ params["w4"] + params["b4"], 0.0)
    g = jnp.maximum(g @ params["w5"] + params["b5"], 0.0)
    g = g @ params["w6"] + params["b6"]                                  # [B, dim_out]
    valid = (jnp.sum(mask, axis=1, keepdims=True) > 0)
    return jnp.where(valid, g, 0.0)


# ------------------------------------ main -------------------------------------
if __name__ == "__main__":
    B, N, DIM_IN, DIM_OUT = 2, 8, 16, 32

    key = jax.random.PRNGKey(0)
    key, kx = jax.random.split(key)
    x = jax.random.normal(kx, (B, N, DIM_IN), dtype=jnp.float32)

    # batch 0: 5 valid elements; batch 1: empty set (exercises the zero branch)
    mask = jnp.array([[1, 1, 1, 1, 1, 0, 0, 0],
                      [0, 0, 0, 0, 0, 0, 0, 0]], dtype=jnp.int32)

    params = make_params(jax.random.PRNGKey(42), DIM_IN, DIM_OUT)

    out = jax.block_until_ready(deepset_forward(x, mask, params))
    ref = deepset_reference(x, mask, params)
    np.testing.assert_allclose(np.asarray(out), np.asarray(ref), rtol=5e-2, atol=5e-2)
    assert out.shape == (B, DIM_OUT)
    assert float(jnp.max(jnp.abs(out[1]))) == 0.0           # empty set -> exact zeros

    # multi-tile accumulator path (several k tiles per batch)
    N2 = 256
    key, kx2, km2 = jax.random.split(key, 3)
    x2 = jax.random.normal(kx2, (B, N2, DIM_IN), dtype=jnp.float32)
    mask2 = (jax.random.uniform(km2, (B, N2)) > 0.5).astype(jnp.int32)
    out2 = jax.block_until_ready(deepset_forward(x2, mask2, params, tile_n=128))
    ref2 = deepset_reference(x2, mask2, params)
    np.testing.assert_allclose(np.asarray(out2), np.asarray(ref2), rtol=5e-2, atol=5e-2)

    # split-set-axis path (v7x two-TensorCore utilisation when B is small)
    out3 = jax.block_until_ready(
        deepset_forward(x2, mask2, params, tile_n=128, n_splits=2))
    np.testing.assert_allclose(np.asarray(out3), np.asarray(ref2), rtol=5e-2, atol=5e-2)

    print("KERNEL_OK")
</pallas_src>

<mosaic_0001>
module attributes {stable_mosaic.version = 11 : i64} {
  func.func @_phi_pool_kernel(%arg0: i32, %arg1: i32, %arg2: i32, %arg3: memref<1x8x17xbf16, #tpu.memory_space<vmem>>, %arg4: memref<17x128xbf16, #tpu.memory_space<vmem>>, %arg5: memref<1x128xf32, #tpu.memory_space<vmem>>, %arg6: memref<128x256xbf16, #tpu.memory_space<vmem>>, %arg7: memref<1x256xf32, #tpu.memory_space<vmem>>, %arg8: memref<1x1x1x256xf32, #tpu.memory_space<vmem>>) attributes {dimension_semantics = [#tpu.dimension_semantics<parallel>, #tpu.dimension_semantics<parallel>, #tpu.dimension_semantics<arbitrary>], iteration_bounds = array<i64: 2, 1, 1>, scalar_prefetch = 0 : i64, scratch_operands = 0 : i64, tpu.core_type = #tpu.core_type<tc>, window_params = [{transform_indices = @transform_0, window_bounds = array<i64: 1, 8, 17>}, {pipeline_mode = #tpu.pipeline_mode<synchronous>, transform_indices = @transform_1, window_bounds = array<i64: 17, 128>}, {pipeline_mode = #tpu.pipeline_mode<synchronous>, transform_indices = @transform_2, window_bounds = array<i64: 1, 128>}, {pipeline_mode = #tpu.pipeline_mode<synchronous>, transform_indices = @transform_3, window_bounds = array<i64: 128, 256>}, {pipeline_mode = #tpu.pipeline_mode<synchronous>, transform_indices = @transform_4, window_bounds = array<i64: 1, 256>}, {transform_indices = @transform_5, window_bounds = array<i64: 1, 1, 1, 256>}]} {
    %c0_i32 = arith.constant 0 : i32
    %0 = arith.cmpi eq, %arg2, %c0_i32 : i32
    %1 = arith.extui %0 : i1 to i32
    %c0_i32_0 = arith.constant 0 : i32
    %2 = arith.cmpi ne, %1, %c0_i32_0 : i32
    scf.if %2 {
      %cst_23 = arith.constant 0.000000e+00 : f32
      %32 = vector.broadcast %cst_23 : f32 to vector<1x1x1x256xf32>
      %c0_24 = arith.constant 0 : index
      %c0_25 = arith.constant 0 : index
      %c0_26 = arith.constant 0 : index
      %c0_27 = arith.constant 0 : index
      %33 = vector.load %arg8[%c0_24, %c0_25, %c0_26, %c0_27] : memref<1x1x1x256xf32, #tpu.memory_space<vmem>>, vector<1x1x1x256xf32>
      tpu.vector_store %arg8[%c0_24, %c0_25, %c0_26, %c0_27], %32 {strides = array<i32>} : memref<1x1x1x256xf32, #tpu.memory_space<vmem>>, vector<1x1x1x256xf32>,
    } else {
    }
    %c0 = arith.constant 0 : index
    %c0_1 = arith.constant 0 : index
    %c0_2 = arith.constant 0 : index
    %3 = vector.load %arg3[%c0, %c0_1, %c0_2] : memref<1x8x17xbf16, #tpu.memory_space<vmem>>, vector<1x8x17xbf16>
    %4 = vector.shape_cast %3 : vector<1x8x17xbf16> to vector<8x17xbf16>
    %5 = vector.extract_strided_slice %4 {offsets = [0, 16], sizes = [8, 1], strides = [1, 1]} : vector<8x17xbf16> to vector<8x1xbf16>
    %6 = arith.extf %5 : vector<8x1xbf16> to vector<8x1xf32>
    %c0_3 = arith.constant 0 : index
    %c0_4 = arith.constant 0 : index
    %7 = vector.load %arg4[%c0_3, %c0_4] : memref<17x128xbf16, #tpu.memory_space<vmem>>, vector<17x128xbf16>
    %cst = arith.constant dense<0.000000e+00> : vector<8x128xf32>
    %8 = tpu.matmul %4, %7, %cst {dimension_numbers = #tpu.dot_dimension_numbers<[1], [0], [0], [1], [0, 0, 1, 1], [], []>} : vector<8x17xbf16>, vector<17x128xbf16>, vector<8x128xf32> -> vector<8x128xf32>
    %c0_5 = arith.constant 0 : index
    %c0_6 = arith.constant 0 : index
    %9 = vector.load %arg5[%c0_5, %c0_6] : memref<1x128xf32, #tpu.memory_space<vmem>>, vector<1x128xf32>
    %10 = vector.broadcast %9 : vector<1x128xf32> to vector<8x128xf32>
    %11 = arith.addf %8, %10 : vector<8x128xf32>
    %cst_7 = arith.constant 0.000000e+00 : f32
    %12 = vector.broadcast %cst_7 : f32 to vector<8x128xf32>
    %13 = arith.maximumf %11, %12 : vector<8x128xf32>
    %14 = arith.truncf %13 : vector<8x128xf32> to vector<8x128xbf16>
    %c0_8 = arith.constant 0 : index
    %c0_9 = arith.constant 0 : index
    %15 = vector.load %arg6[%c0_8, %c0_9] : memref<128x256xbf16, #tpu.memory_space<vmem>>, vector<128x256xbf16>
    %cst_10 = arith.constant dense<0.000000e+00> : vector<8x256xf32>
    %16 = tpu.matmul %14, %15, %cst_10 {dimension_numbers = #tpu.dot_dimension_numbers<[1], [0], [0], [1], [0, 0, 1, 1], [], []>} : vector<8x128xbf16>, vector<128x256xbf16>, vector<8x256xf32> -> vector<8x256xf32>
    %c0_11 = arith.constant 0 : index
    %c0_12 = arith.constant 0 : index
    %17 = vector.load %arg7[%c0_11, %c0_12] : memref<1x256xf32, #tpu.memory_space<vmem>>, vector<1x256xf32>
    %18 = vector.broadcast %17 : vector<1x256xf32> to vector<8x256xf32>
    %19 = arith.addf %16, %18 : vector<8x256xf32>
    %cst_13 = arith.constant 0.000000e+00 : f32
    %20 = vector.broadcast %cst_13 : f32 to vector<8x256xf32>
    %21 = arith.maximumf %19, %20 : vector<8x256xf32>
    %c0_14 = arith.constant 0 : index
    %c0_15 = arith.constant 0 : index
    %c0_16 = arith.constant 0 : index
    %c0_17 = arith.constant 0 : index
    %22 = vector.load %arg8[%c0_14, %c0_15, %c0_16, %c0_17] : memref<1x1x1x256xf32, #tpu.memory_space<vmem>>, vector<1x1x1x256xf32>
    %23 = vector.shape_cast %22 : vector<1x1x1x256xf32> to vector<1x256xf32>
    %24 = vector.broadcast %6 : vector<8x1xf32> to vector<8x256xf32>
    %25 = arith.mulf %21, %24 : vector<8x256xf32>
    %cst_18 = arith.constant dense<0.000000e+00> : vector<256xf32>
    %26 = vector.multi_reduction <add>, %25, %cst_18 [0] : vector<8x256xf32> to vector<256xf32>
    %27 = vector.shape_cast %26 : vector<256xf32> to vector<1x256xf32>
    %28 = arith.addf %23, %27 : vector<1x256xf32>
    %c0_19 = arith.constant 0 : index
    %c0_20 = arith.constant 0 : index
    %c0_21 = arith.constant 0 : index
    %c0_22 = arith.constant 0 : index
    %29 = vector.load %arg8[%c0_19, %c0_20, %c0_21, %c0_22] : memref<1x1x1x256xf32, #tpu.memory_space<vmem>>, vector<1x1x1x256xf32>
    %30 = vector.shape_cast %29 : vector<1x1x1x256xf32> to vector<1x256xf32>
    %31 = vector.shape_cast %28 : vector<1x256xf32> to vector<1x1x1x256xf32>
    tpu.vector_store %arg8[%c0_19, %c0_20, %c0_21, %c0_22], %31 {strides = array<i32>} : memref<1x1x1x256xf32, #tpu.memory_space<vmem>>, vector<1x1x1x256xf32>,
    return
  }
  func.func @transform_0(%arg0: i32, %arg1: i32, %arg2: i32) -> (i32, i32, i32) {
    %c1_i32 = arith.constant 1 : i32
    %0 = arith.muli %arg1, %c1_i32 : i32
    %1 = arith.addi %0, %arg2 : i32
    %c0_i32 = arith.constant 0 : i32
    %c0_i32_0 = arith.constant 0 : i32
    return %arg0, %1, %c0_i32 : i32, i32, i32
  }
  func.func @transform_1(%arg0: i32, %arg1: i32, %arg2: i32) -> (i32, i32) {
    %c0_i32 = arith.constant 0 : i32
    %c0_i32_0 = arith.constant 0 : i32
    %c0_i32_1 = arith.constant 0 : i32
    return %c0_i32, %c0_i32_0 : i32, i32
  }
  func.func @transform_2(%arg0: i32, %arg1: i32, %arg2: i32) -> (i32, i32) {
    %c0_i32 = arith.constant 0 : i32
    %c0_i32_0 = arith.constant 0 : i32
    %c0_i32_1 = arith.constant 0 : i32
    return %c0_i32, %c0_i32_0 : i32, i32
  }
  func.func @transform_3(%arg0: i32, %arg1: i32, %arg2: i32) -> (i32, i32) {
    %c0_i32 = arith.constant 0 : i32
    %c0_i32_0 = arith.constant 0 : i32
    %c0_i32_1 = arith.constant 0 : i32
    return %c0_i32, %c0_i32_0 : i32, i32
  }
  func.func @transform_4(%arg0: i32, %arg1: i32, %arg2: i32) -> (i32, i32) {
    %c0_i32 = arith.constant 0 : i32
    %c0_i32_0 = arith.constant 0 : i32
    %c0_i32_1 = arith.constant 0 : i32
    return %c0_i32, %c0_i32_0 : i32, i32
  }
  func.func @transform_5(%arg0: i32, %arg1: i32, %arg2: i32) -> (i32, i32, i32, i32) {
    %c0_i32 = arith.constant 0 : i32
    %c0_i32_0 = arith.constant 0 : i32
    %c0_i32_1 = arith.constant 0 : i32
    return %arg0, %arg1, %c0_i32, %c0_i32_0 : i32, i32, i32, i32
  }
}

</mosaic_0001>

<bundles_post_ra>
// kernel: tpu_custom_call.1
= control target key start
LH: loop header
LB: loop body
LE: loop exit
PB: predicated region body
PF: predicated region fallthrough
CT: control target
= control target key end

     0   :  { %10 = vsyncpa [#allocation3], 0  ;;  %s1356_s0 = inlined_call_operand.hbm [shape: bf16[2,8,17], index: 0, kind: input, shape index: {}]   ;;  %s1357_s1 = inlined_call_operand.hbm [shape: bf16[17,128], index: 1, kind: input, shape index: {}]   ;;  %s1358_s2 = inlined_call_operand.vmem [shape: f32[1,128], index: 2, kind: input, shape index: {}]   ;;  %s1359_s3 = inlined_call_operand.hbm [shape: bf16[128,256], index: 3, kind: input, shape index: {}]   ;;  %s1360_s4 = inlined_call_operand.vmem [shape: f32[1,256], index: 4, kind: input, shape index: {}]   ;;  %s1361_s5 = inlined_call_operand.hbm [shape: f32[2,1,1,256], index: 5, kind: output, shape index: {}]  }
   0x1   :  { %12 = vsyncpa [#allocation3 + $0x1], 0 }
   0x2   :  { %13 = vsyncpa [#allocation6], 0 }
   0x3   :  { %14 = vsyncpa [#allocation4], 0 }
   0x4   :  { %16 = vsyncpa [#allocation4 + $0x1], 0  ;;  %s1083_s18 = smov 0   ;;  %s1085_s19 = smov 0  }
   0x5   :  { %s1087_s20 = smov 0   ;;  %s1089_s21 = smov 0  }
   0x6   :  { %s1091_s22 = smov 0   ;;  %s1093_s23 = smov 0  }
   0x7 LB: > { %s697_s24 = sadd.s32 4294967295, %s1038_s23   ;;  %s698_s25 = sadd.s32 4294967294, %s1038_s23   ;;  %s1038_s23 = sphi %s1093_s23, %s22_s23   ;;  %s1034_s22 = sphi %s1091_s22, %s1385_s22   ;;  %s1030_s21 = sphi %s1089_s21, %s1384_s21   ;;  %s1026_s20 = sphi %s1087_s20, %s1383_s20   ;;  %s1022_s19 = sphi %s1085_s19, %s1382_s19   ;;  %s1018_s18 = sphi %s1083_s18, %s1381_s18  }
   0x8   : > { %p65_p0 = scmp.ne.s32.totalorder %s1022_s19, %s1018_s18  ;;  %p1117_p1 = scmp.eq.s32.totalorder %s697_s24, 0 }
   0x9   : > { %p1121_p2 = scmp.eq.s32.totalorder %s697_s24, 1  ;;  %p181_p3 = scmp.eq.s32.totalorder %s698_s25, 1 }
   0xa   : > { %s1366_s26 = scalar_select %p1117_p1, 1, 0 }
   0xb   : > { %p1127_p4 = por %p1117_p1, %p65_p0  ;;  %p699_p5 = scmp.ge.s32.totalorder %s1038_s23, 1 }
   0xc   : > { %p1132_p6 = por %p181_p3, %p65_p0  ;;  %p188_p7 = scmp.lt.s32.totalorder %s1038_s23, 3 }
   0xd   : > { %s1368_s28 = scalar_select %p1127_p4, 1, 0 }
   0xe   : > { %s1369_s29 = scalar_select %p1132_p6, 1, 0 }
   0xf   : > { %p1137_p8 = pnand %p699_p5, %p188_p7  ;;  %s1040_s6 = smov [#allocation5]  }
  0x10   : > { %s200_s7 = sshll.u32 %s1040_s6, 4  ;;  %s1041_s9 = smov [#allocation7]   ;;  %s1141_s7 = int_to_ptr.vmem [resolvable:$true] %s200_s7 }
  0x11   : > { %p759_p9 = pneg %p1137_p8  ;;  %s216_s10 = sshll.u32 %s1041_s9, 4  ;;  %s1152_s10 = int_to_ptr.vmem [resolvable:$true] %s216_s10 }
  0x12   : > { %s866_s13 = scalar_lea.hbm %s1357_s1, 192 }
  0x13   : > { %p1148_p11 = pnand %p759_p9, %p1117_p1  ;;  %p867_p12 = scmp.ne.s32.totalorder %s1357_s1, %s866_s13 }
  0x14   : > { %p873_p5 = scmp.lt.u32.totalorder %s866_s13, %s1357_s1 }
  0x15   : > { %p868_p13 = pneg %p1148_p11 }
  0x17   : > { %p869_p0 = pnand %p868_p13, %p867_p12 }
  0x19   : > { %p870_p3 = pneg %p869_p0 }
  0x1b   : > { %p875_p7 = pnand %p873_p5, %p870_p3 }
  0x1d   : > { %878 = shalt.err (!%p875_p7)
}
  0x1e   : > { %s879_s24 = scalar_lea.vmem %s1141_s7, 192  ;;  %p887_p1 = scmp.lt.s32.totalorder %s1141_s7, %s1141_s7 }
  0x1f   : > { %p880_p9 = scmp.ne.s32.totalorder %s1141_s7, %s879_s24  ;;  %p888_p12 = scmp.lt.s32.totalorder %s879_s24, %s879_s24 }
  0x21   : > { %p882_p10 = pnand %p880_p9, %p868_p13  ;;  %p889_p0 = por %p888_p12, %p887_p1 }
  0x23   : > { %p883_p6 = pneg %p882_p10 }
  0x25   : > { %p890_p4 = pnand %p889_p0, %p883_p6 }
  0x27   : > { %893 = shalt.err (!%p890_p4)
}
  0x28   : > { %s1042_s25 = smov 64   ;;  %s1043_s6 = smov 4  }
  0x29   : > { %762 = dma.hbm_to_vmem [thread:$0]  (!%p1148_p11), %s1357_s1, 192, %s1141_s7, [#allocation6], %s1042_s25, %s1042_s25, %s1043_s6  }
  0x2a   : > { %s894_s14 = scalar_lea.hbm %s1359_s3, 2048 }
  0x2b   : > { %p895_p1 = scmp.ne.s32.totalorder %s1359_s3, %s894_s14  ;;  %p901_p10 = scmp.lt.u32.totalorder %s894_s14, %s1359_s3 }
  0x2d   : > { %p897_p4 = pnand %p895_p1, %p868_p13 }
  0x2f   : > { %p898_p6 = pneg %p897_p4 }
  0x31   : > { %p903_p3 = pnand %p901_p10, %p898_p6 }
  0x33   : > { %906 = shalt.err (!%p903_p3)
}
  0x34   : > { %s907_s7 = scalar_lea.vmem %s1152_s10, 2048  ;;  %p915_p12 = scmp.lt.s32.totalorder %s1152_s10, %s1152_s10 }
  0x35   : > { %p908_p5 = scmp.ne.s32.totalorder %s1152_s10, %s907_s7  ;;  %p916_p0 = scmp.lt.s32.totalorder %s907_s7, %s907_s7 }
  0x37   : > { %p910_p7 = pnand %p908_p5, %p868_p13  ;;  %p917_p1 = por %p916_p0, %p915_p12 }
  0x39   : > { %p911_p9 = pneg %p910_p7 }
  0x3b   : > { %p918_p4 = pnand %p917_p1, %p911_p9 }
  0x3d   : > { %921 = shalt.err (!%p918_p4)
}
  0x3e   : > { %s1044_s25 = smov 128   ;;  %s1045_s6 = smov 8  }
  0x3f   : > { %765 = dma.hbm_to_vmem [thread:$0]  (!%p1148_p11), %s1359_s3, 2048, %s1152_s10, [#allocation6], %s1044_s25, %s1044_s25, %s1045_s6  }
  0x40   : > { %s41_s12 = sadd.s32 1, %s1034_s22  ;;  %s52_s13 = sadd.s32 1, %s1026_s20 }
  0x41   : > { %p43_p13 = scmp.ge.s32.totalorder %s41_s12, 2  ;;  %p59_p6 = scmp.ne.s32.totalorder %s1026_s20, %s1022_s19 }
  0x42   : > { %p60_p10 = scmp.eq.s32.totalorder %s1038_s23, 0  ;;  %p776_p3 = scmp.lt.s32.totalorder %s1038_s23, 2 }
  0x43   : > { %s1387_s12 = smov (%p43_p13, %s41_s12), 0  ;;  %p1216_p7 = por %p1121_p2, %p59_p6 }
  0x44   : > { %p61_p5 = por %p60_p10, %p59_p6  ;;  %s47_s8 = ssub.s32 %s1034_s22, %s1387_s12 }
  0x45   : > { %s1372_s14 = scalar_select %p1216_p7, 1, 0 }
  0x46   : > { %s233_s15 = sand.u32 1, %s1026_s20   ;;  %p50_p9 = scmp.eq.s32.totalorder %s47_s8, 0 }
  0x47   : > { %s703_s10 = sshll.u32 %s233_s15, 2  ;;  %s704_s16 = sshll.u32 %s1034_s22, 6 }
  0x48   : > { %s1225_s17 = scalar_select %p50_p9, %s1026_s20, %s52_s13  }
  0x49   : > { %s1230_s25 = scalar_lea.hbm %s1356_s0, %s704_s16  ;;  %s237_s27 = scalar_lea.vmem [#allocation2], %s703_s10 }
  0x4a   : > { %s246_s6 = sshll.u32 %s237_s27, 4  ;;  %p1234_p2 = pnand %p776_p3, %p61_p5  ;;  %s1238_s6 = int_to_ptr.vmem [resolvable:$true] %s246_s6 }
  0x4b   : > { %s234_s11 = scalar_lea.sflag [#allocation3], %s233_s15  ;;  %s922_s13 = scalar_lea.hbm %s1230_s25, 64 }
  0x4c   : > { %p923_p11 = scmp.ne.s32.totalorder %s1230_s25, %s922_s13  ;;  %p924_p12 = pneg %p1234_p2 }
  0x4d   : > { %s927_s16 = scalar_lea.hbm %s1356_s0, 128  ;;  %p928_p4 = scmp.lt.u32.totalorder %s1230_s25, %s1356_s0 }
  0x4e   : > { %p925_p0 = pnand %p924_p12, %p923_p11  ;;  %p929_p13 = scmp.lt.u32.totalorder %s927_s16, %s922_s13 }
  0x4f   : > { %p931_p10 = scmp.lt.u32.totalorder %s922_s13, %s1230_s25 }
  0x50   : > { %p926_p1 = pneg %p925_p0  ;;  %p930_p6 = por %p929_p13, %p928_p4 }
  0x52   : > { %p932_p3 = por %p931_p10, %p930_p6 }
  0x54   : > { %p933_p5 = pnand %p932_p3, %p926_p1 }
  0x56   : > { %936 = shalt.err (!%p933_p5)
}
  0x57   : > { %s937_s15 = scalar_lea.vmem %s1238_s6, 64  ;;  %s1046_s27 = smov [#allocation2]  }
  0x58   : > { %p938_p9 = scmp.ne.s32.totalorder %s1238_s6, %s937_s15  ;;  %s942_s8 = sshll.u32 %s1046_s27, 4  ;;  %s943_s8 = int_to_ptr.vmem [resolvable:$false] %s942_s8 }
  0x59   : > { %s944_s10 = scalar_lea.vmem %s943_s8, 128  ;;  %p945_p7 = scmp.lt.s32.totalorder %s1238_s6, %s943_s8 }
  0x5a   : > { %p940_p11 = pnand %p938_p9, %p924_p12  ;;  %p946_p4 = scmp.lt.s32.totalorder %s944_s10, %s937_s15 }
  0x5c   : > { %p941_p0 = pneg %p940_p11  ;;  %p947_p13 = por %p946_p4, %p945_p7 }
  0x5e   : > { %p948_p6 = pnand %p947_p13, %p941_p0 }
  0x60   : > { %951 = shalt.err (!%p948_p6)
}
  0x61   : > { %769 = dma.hbm_to_vmem [thread:$0]  (!%p1234_p2), %s1230_s25, 64, %s1238_s6, %s234_s11  }
  0x62   : > { %255 = sbr.rel (%p1137_p8) target bundleno = 589 (0x24d), region = 40  ;;  %s1268_s13 = sand.u32 (!%p1137_p8), 1, %s1022_s19  }
  0x63   : > { %s706_s16 = sshll.u32 (!%p1137_p8), %s1268_s13, 2  ;;  %s258_s24 = scalar_lea.sflag (!%p1137_p8), [#allocation3], %s1268_s13 }
  0x64   : > { %s261_s7 = scalar_lea.vmem (!%p1137_p8), [#allocation2], %s706_s16  ;;  %p1374_p7 = scmp.ne.s32.totalorder (!%p1137_p8), %s1368_s28, 0 }
  0x69   : > { %1005 = dma.done.wait (%p1374_p7), %s258_s24, 64  }
  0x6a   : > { %1007 = vsyncadd (%p1374_p7), %s258_s24, 4294967232  ;;  %p1375_p12 = scmp.ne.s32.totalorder %s1366_s26, 0 }
  0x6c   : > { %1009 = dma.done.wait (%p1375_p12), [#allocation6], 2240  }
  0x6d   : > { %1011 = vsyncadd (%p1375_p12), [#allocation6], 4294965056  ;;  %s709_s30 = sshll.u32 %s1268_s13, 1  ;;  %v302_v0 = vlaneseq  ;;  %v1047_v1 = vmov 0.0   ;;  %v1048_v2 = vmov 0   ;;  %vm1049_vm1 = vmmov 0  }
  0x6e   : > { %739 = vmatprep.subr.bf16.mxu0 %v1047_v1  ;;  %520 = vmatprep.mubr.bf16.mxu1 %v1048_v2  ;;  %s1286_s28 = scalar_lea.vmem [#allocation8], %s709_s30  ;;  %vm332_vm2 = vcmask 1040384   ;;  %v840_v4 = vld [vmem:[#allocation5] sm:$0xff]   ;;  %v841_v6 = vld [vmem:[#allocation5 + $0x8] ss:$0 sps:$4 sm:$0x11]  }
  0x6f   : > { %vm1282_vm0 = vcmp.lt.s32.totalorder %v302_v0, 256  ;;  %743 = vmatprep.mubr.msk.bf16.mxu0 %vm1049_vm1, %v1047_v1  ;;  %v334_v5 = vsel %vm332_vm2, 65535, %v1048_v2  ;;  %740 = vmatpush3.bf16.msra.mxu0 %v840_v4  ;;  %v842_v7 = vld [vmem:[#allocation7 + $0x4] ss:$8 sps:$4 sm:$0xff]   ;;  %v844_v9 = vld [vmem:[#allocation7] ss:$8 sps:$4 sm:$0xff]  }
  0x70   : > { %306 = vst.msk [vmem:[%s1286_s28] sm:$0x3] %vm1282_vm0, %v1047_v1  ;;  %741 = vmatprep.subr.bf16.mxu0 %v1047_v1  ;;  %v336_v8 = vand.u32 %v841_v6, %v334_v5  ;;  %488 = vmatprep.subr.bf16.mxu1 %v842_v7  ;;  %v845_v10 = vld [vmem:[#allocation7 + $0x14] ss:$8 sps:$4 sm:$0xff]   ;;  %v307_v11 = vld [vmem:[%s261_s7] sm:$0xf] }
  0x71   : > { %489 = vmatpush1.bf16.msra.mxu1 %v844_v9  ;;  %v847_v12 = vld [vmem:[#allocation7 + $0x10] ss:$8 sps:$4 sm:$0xff]   ;;  %vm328_vm3 = vcmask 138240   ;;  %v848_v13 = vld [vmem:[#allocation7 + $0x24] ss:$8 sps:$4 sm:$0xff]   ;;  %v308_v25 = vunpack.c.l.bf16 %v307_v11  ;;  %v1050_v26 = vmov 16  }
  0x72   : > { %490 = vmatprep.subr.bf16.mxu1 %v845_v10  ;;  %v850_v14 = vld [vmem:[#allocation7 + $0x20] ss:$8 sps:$4 sm:$0xff]   ;;  %v851_v15 = vld [vmem:[#allocation7 + $0x34] ss:$8 sps:$4 sm:$0xff]   ;;  %v853_v16 = vld [vmem:[#allocation7 + $0x30] ss:$8 sps:$4 sm:$0xff]   ;;  %839 = vset.pattern.permute.xlu0 %v1050_v26 }
  0x73   : > { %742 = vmatpush3.bf16.msra.mxu0 %v336_v8  ;;  %v854_v17 = vld [vmem:[#allocation7 + $0x44] ss:$8 sps:$4 sm:$0xff]   ;;  %v856_v18 = vld [vmem:[#allocation7 + $0x40] ss:$8 sps:$4 sm:$0xff]   ;;  %v857_v19 = vld [vmem:[#allocation7 + $0x54] ss:$8 sps:$4 sm:$0xff]   ;;  %534 = vperm.xlu0 %839, %v308_v25  }
  0x74   : > { %v859_v20 = vld [vmem:[#allocation7 + $0x50] ss:$8 sps:$4 sm:$0xff]   ;;  %v860_v21 = vld [vmem:[#allocation7 + $0x64] ss:$8 sps:$4 sm:$0xff]   ;;  %v862_v22 = vld [vmem:[#allocation7 + $0x60] ss:$8 sps:$4 sm:$0xff]  }
  0x75   : > { %491 = vmatpush1.bf16.msra.mxu1 %v847_v12  ;;  %v863_v23 = vld [vmem:[#allocation7 + $0x74] ss:$8 sps:$4 sm:$0xff]   ;;  %v865_v24 = vld [vmem:[#allocation7 + $0x70] ss:$8 sps:$4 sm:$0xff]   ;;  %v710_v27 = vld [vmem:[%s1358_s2] ss:$0 sm:$0xff] }
  0x76   : > { %744 = vmatmul.mubr.msk.bf16.vlgmr.msra.gmra.mrb[0].mxu0 %vm328_vm3, %v307_v11  ;;  %492 = vmatprep.subr.bf16.mxu1 %v848_v13  ;;  %v399_v35 = vshrl.u32 %v302_v0, 7  ;;  %v396_v37 = vld [vmem:[%s1360_s4] sm:$0x3]  ;;  %v1051_v55 = vmov 1966171168   ;;  %s735_s11 = sshll.u32 %s1030_s21, 5 }
  0x77   : > { %v555_v56 = vunpack.c.l.s4 %v1051_v55  ;;  %v531_v7 = vld [vmem:[%s1286_s28] sm:$0x3]  ;;  %s592_s15 = sshll.u32 %s1286_s28, 4  ;;  %s1304_s10 = scalar_lea.hbm %s1361_s5, %s735_s11  ;;  %s1306_s15 = int_to_ptr.vmem [resolvable:$true] %s592_s15 }
  0x78   : > { %v400_v36 = vsub.s32 0, %v399_v35  ;;  %v404_v38 = vsub.s32 1, %v399_v35  ;;  %s576_s16 = scalar_lea.sflag [#allocation4], %s1268_s13  ;;  %s952_s24 = scalar_lea.vmem %s1306_s15, 32 }
  0x79   : > { %493 = vmatpush1.bf16.msra.mxu1 %v850_v14  ;;  %v556_v61 = vunpack.c.0.s8 %v555_v56  ;;  %p953_p8 = scmp.ne.s32.totalorder %s1306_s15, %s952_s24  ;;  %p1378_p2 = scmp.ne.s32.totalorder %s1372_s14, 0 }
  0x7a   : > { %494 = vmatprep.subr.bf16.mxu1 %v851_v15  ;;  %v401_v39 = vrot.slane %v396_v37, %v400_v36  ;;  %v405_v40 = vrot.slane %v396_v37, %v404_v38  ;;  %s1052_s21 = smov [#allocation8]  }
  0x7b   : > { %v559_v2 = vsub.s32 %v556_v61, %v399_v35  ;;  %p954_p1 = pnand %p953_p8, %p1378_p2  ;;  %s956_s7 = sshll.u32 %s1052_s21, 4  ;;  %s957_s7 = int_to_ptr.vmem [resolvable:$false] %s956_s7 }
  0x7c   : > { %s958_s30 = scalar_lea.vmem %s957_s7, 64  ;;  %p959_p3 = scmp.lt.s32.totalorder %s1306_s15, %s957_s7 }
  0x7d   : > { %495 = vmatpush1.bf16.msra.mxu1 %v853_v16  ;;  %p955_p10 = pneg %p954_p1  ;;  %p960_p5 = scmp.lt.s32.totalorder %s958_s30, %s952_s24 }
  0x7e   : > { %496 = vmatprep.subr.bf16.mxu1 %v854_v17 }
  0x7f   : > { %p961_p9 = por %p960_p5, %p959_p3 }
  0x81   : > { %497 = vmatpush1.bf16.msra.mxu1 %v856_v18  ;;  %p962_p11 = pnand %p961_p9, %p955_p10 }
  0x82   : > { %498 = vmatprep.subr.bf16.mxu1 %v857_v19 }
  0x85   : > { %499 = vmatpush1.bf16.msra.mxu1 %v859_v20 }
  0x86   : > { %500 = vmatprep.subr.bf16.mxu1 %v860_v21 }
  0x89   : > { %501 = vmatpush1.bf16.msra.mxu1 %v862_v22 }
  0x8a   : > { %502 = vmatprep.subr.bf16.mxu1 %v863_v23 }
  0x8d   : > { %503 = vmatpush1.bf16.msra.mxu1 %v865_v24 }
  0xf2   : > { %v535_v46 = vpop.permute.xlu0 %534 }
 0x149   : > { %v372_v28 = vpop.f32.mrb[0].mxu0 }
 0x14a   : > { %v373_v29 = vadd.f32 %v710_v27, %v372_v28  ;;  %v745_v30 = vpop.f32.mrb[1].mxu0 }
 0x14b   : > { %v375_v31 = vpop.f32.mrb[2].mxu0 }
 0x14c   : > { %v378_v32 = vmax.f32 %v373_v29, 0.0  ;;  %v746_v33 = vpop.f32.mrb[3].mxu0 }
 0x14e   : > { %v379_v34 = vpack.c.bf16 %v378_v32, %v378_v32 }
 0x150   : > { %521 = vmatmul.mubr.bf16.vlgmr.msra.gmra.mrb[0].mxu1 %v379_v34 }
 0x223   : > { %v522_v41 = vpop.f32.mrb[0].mxu1 }
 0x224   : > { %v523_v42 = vadd.f32 %v522_v41, %v401_v39  ;;  %v524_v43 = vpop.f32.mrb[1].mxu1 }
 0x225   : > { %v525_v44 = vadd.f32 %v524_v43, %v405_v40  ;;  %v526_v45 = vpop.f32.mrb[2].mxu1 }
 0x226   : > { %v529_v47 = vmax.f32 %v523_v42, 0.0  ;;  %v527_v48 = vpop.f32.mrb[3].mxu1 }
 0x227   : > { %v530_v49 = vmax.f32 %v525_v44, 0.0 }
 0x228   : > { %v537_v50 = vmul.f32 %v535_v46, %v529_v47 }
 0x229   : > { %v538_v51 = vmul.f32 %v535_v46, %v530_v49 }
 0x22a   : > { %v539_v52 = vrot.slane %v537_v50, 4 }
 0x22b   : > { %v545_v53 = vrot.slane %v538_v51, 4 }
 0x22c   : > { %v540_v54 = vadd.f32 %v539_v52, %v537_v50 }
 0x22d   : > { %v546_v57 = vadd.f32 %v545_v53, %v538_v51 }
 0x22e   : > { %v541_v58 = vrot.slane %v540_v54, 2 }
 0x22f   : > { %v547_v59 = vrot.slane %v546_v57, 2 }
 0x230   : > { %v542_v60 = vadd.f32 %v541_v58, %v540_v54 }
 0x231   : > { %v548_v62 = vadd.f32 %v547_v59, %v546_v57 }
 0x232   : > { %v543_v63 = vrot.slane %v542_v60, 1 }
 0x233   : > { %v549_v0 = vrot.slane %v548_v62, 1 }
 0x234   : > { %v544_v1 = vadd.f32 %v543_v63, %v542_v60 }
 0x235   : > { %v550_v4 = vadd.f32 %v549_v0, %v548_v62 }
 0x237   : > { %v553_v5 = vcombine.low %v544_v1, %v550_v4 }
 0x239   : > { %v560_v6 = vrot.slane %v553_v5, %v559_v2 }
 0x23b   : > { %v567_v8 = vrot.slane %v560_v6, %v559_v2 }
 0x23d   : > { %v569_v9 = vadd.f32 %v567_v8, %v531_v7 }
 0x23f   : > { %574 = vst.msk [vmem:[%s1286_s28] sm:$0x3] %vm1282_vm0, %v569_v9 }
 0x240   : > { %965 = shalt.err (!%p962_p11)
}
 0x241   : > { %s966_s13 = scalar_lea.hbm %s1304_s10, 32  ;;  %s970_s25 = scalar_lea.hbm %s1361_s5, 64 }
 0x242   : > { %p967_p0 = scmp.ne.s32.totalorder %s1304_s10, %s966_s13  ;;  %p971_p6 = scmp.lt.u32.totalorder %s1304_s10, %s1361_s5 }
 0x243   : > { %p972_p7 = scmp.lt.u32.totalorder %s970_s25, %s966_s13  ;;  %p974_p8 = scmp.lt.u32.totalorder %s966_s13, %s1304_s10 }
 0x244   : > { %p968_p4 = pnand %p967_p0, %p1378_p2 }
 0x245   : > { %p973_p12 = por %p972_p7, %p971_p6 }
 0x246   : > { %p969_p13 = pneg %p968_p4 }
 0x247   : > { %p975_p1 = por %p974_p8, %p973_p12 }
 0x249   : > { %p976_p10 = pnand %p975_p1, %p969_p13 }
 0x24b   : > { %979 = shalt.err (!%p976_p10)
}
 0x24c   : > { %757 = dma.vmem_to_hbm [thread:$0]  (%p1378_p2), %s1306_s15, 32, %s1304_s10, %s576_s16  }
 0x24d PF: > { %s604_s11 = sand.u32 1, %s1018_s18   ;;  %p1379_p3 = scmp.ne.s32.totalorder %s1369_s29, 0 }
 0x24e   : > { %p1380_p5 = scmp.ge.s32.totalorder %s1038_s23, 2  ;;  %s605_s27 = scalar_lea.sflag [#allocation4], %s604_s11 }
 0x250   : > { %p771_p9 = pnand %p1380_p5, %p1379_p3 }
 0x252   : > { %1013 = dma.done.wait (!%p771_p9), %s605_s27, 32  }
 0x253   : > { %1015 = vsyncadd (!%p771_p9), %s605_s27, 4294967264  ;;  %s22_s23 = sadd.s32 1, %s1038_s23   ;;  %s1381_s18 = smov %s1022_s19 }
 0x254   : > { %p19_p11 = scmp.ge.s32.totalorder %s22_s23, 4   ;;  %s1382_s19 = smov %s1026_s20 }
 0x255   : > { %s1383_s20 = smov %s1225_s17  ;;  %s1384_s21 = smov %s1034_s22 }
 0x256   : > { %s1385_s22 = smov %s1387_s12  ;;  %21 = sbr.rel (!%p19_p11) target bundleno = 7 (0x7), region = 97 }
 0x25d   :  { %610 = vsyncpa [#allocation3], 1 }
 0x25e   :  { %612 = vsyncpa [#allocation3 + $0x1], 1 }
 0x25f   :  { %613 = vsyncpa [#allocation6], 1 }
 0x260   :  { %614 = vsyncpa [#allocation4], 1 }
 0x261   :  { %616 = vsyncpa [#allocation4 + $0x1], 1 }

</bundles_post_ra>
